<compile_context>
chip_gen: v5e
topology: v5e:2x2
jax: 0.10.0
libtpu: 0.0.40
codegen_flags: <defaults>
</compile_context>

<pallas_src>
from functools import partial

import jax
import jax.numpy as jnp
from jax.experimental import pallas as pl
from jax.experimental.pallas import tpu as pltpu


_VMEM_LIMIT = 48 * 1024 * 1024  # conservative: fits v7x's 64 MiB physical VMEM


def _pick_block(n, target):
    """Largest block <= target that divides n and is a multiple of 8 (or n itself)."""
    if n <= target:
        return n
    for b in range(min(target, n), 0, -1):
        if n % b == 0 and b % 8 == 0:
            return b
    return n


# --------------------------------------------------------------------------- #
# Kernel 1: per-head QKV projection -> head-major (B, H, N, D) Q, K, V.
# --------------------------------------------------------------------------- #
def _qkv_proj_kernel(x_ref, wq_ref, wk_ref, wv_ref, bq_ref, bk_ref, bv_ref,
                     q_ref, k_ref, v_ref):
    x = x_ref[...]                                          # (TS, C)
    q_ref[...] = (jnp.dot(x, wq_ref[...], preferred_element_type=jnp.float32)
                  + bq_ref[...]).astype(q_ref.dtype)        # scale pre-folded
    k_ref[...] = (jnp.dot(x, wk_ref[...], preferred_element_type=jnp.float32)
                  + bk_ref[...]).astype(k_ref.dtype)
    v_ref[...] = (jnp.dot(x, wv_ref[...], preferred_element_type=jnp.float32)
                  + bv_ref[...]).astype(v_ref.dtype)


# --------------------------------------------------------------------------- #
# Kernel 2: flash-style attention (online softmax) + fused output projection.
# --------------------------------------------------------------------------- #
def _flash_attn_kernel(q_ref, k_ref, v_ref, wp_ref, bp_ref, o_ref,
                       m_sc, l_sc, acc_sc):
    kv = pl.program_id(2)

    @pl.when(kv == 0)
    def _init():
        m_sc[...] = jnp.full_like(m_sc[...], -jnp.inf)
        l_sc[...] = jnp.zeros_like(l_sc[...])
        acc_sc[...] = jnp.zeros_like(acc_sc[...])

    q = q_ref[...]                                          # (H, TQ, D), pre-scaled
    k = k_ref[...]                                          # (H, TK, D)
    v = v_ref[...]                                          # (H, TK, D)

    # (H, TQ, TK) score tile -- head-batched matmul, f32 accumulation.
    s = jnp.einsum("hqd,hkd->hqk", q, k, preferred_element_type=jnp.float32)

    m_prev = m_sc[...]
    m_new = jnp.maximum(m_prev, s.max(axis=-1, keepdims=True))
    alpha = jnp.exp(m_prev - m_new)
    p = jnp.exp(s - m_new)
    l_sc[...] = alpha * l_sc[...] + p.sum(axis=-1, keepdims=True)
    acc_sc[...] = alpha * acc_sc[...] + jnp.einsum(
        "hqk,hkd->hqd", p.astype(v.dtype), v, preferred_element_type=jnp.float32)
    m_sc[...] = m_new

    @pl.when(kv == pl.num_programs(2) - 1)
    def _finalize():
        # Normalize with the (cheap, EUP) approximate reciprocal.
        o = acc_sc[...] * pl.reciprocal(l_sc[...], approx=True)      # (H, TQ, D)
        # Per-head output projection summed over heads == concat(heads) @ W_proj,
        # without materializing the concat.
        y = jnp.einsum("hqd,hdc->hqc", o.astype(wp_ref.dtype), wp_ref[...],
                       preferred_element_type=jnp.float32)           # (H, TQ, Cp)
        y = y.sum(axis=0) + bp_ref[0]                                # (TQ, Cp)
        o_ref[...] = y.astype(o_ref.dtype)


# --------------------------------------------------------------------------- #
# Wrapper
# --------------------------------------------------------------------------- #
@partial(jax.jit, static_argnames=("num_heads",))
def standard_attention(x, w_qkv, b_qkv, w_proj, b_proj, *, num_heads):
    B, N, C = x.shape
    H = num_heads
    assert C % H == 0
    D = C // H
    scale = D ** -0.5

    # ---- host-side weight rearrangement (pure layout, done once under jit) ----
    # w_qkv columns are ordered (which, head, d) exactly as PyTorch's reshape.
    w3 = w_qkv.reshape(C, 3, H, D)
    wq = jnp.transpose(w3[:, 0], (1, 0, 2)) * scale          # (H, C, D), scale folded
    wk = jnp.transpose(w3[:, 1], (1, 0, 2))                  # (H, C, D)
    wv = jnp.transpose(w3[:, 2], (1, 0, 2))                  # (H, C, D)
    b3 = b_qkv.reshape(3, H, 1, D)
    bq = b3[0] * scale                                       # (H, 1, D)
    bk = b3[1]
    bv = b3[2]

    # Output projection: rows of w_proj are indexed by (head, d); pad the output
    # (lane) dimension to a multiple of 128 for lane-dense stores.
    C_pad = ((C + 127) // 128) * 128
    wp = w_proj.reshape(H, D, C)                             # (H, D, C)
    bp = b_proj
    if C_pad != C:
        wp = jnp.pad(wp, ((0, 0), (0, 0), (0, C_pad - C)))
        bp = jnp.pad(bp, ((0, C_pad - C),))
    bp = bp.reshape(1, C_pad)

    # ---- stage 1: QKV projection into head-major (B, H, N, D) ----
    TS = _pick_block(N, 256)
    nS = N // TS
    qkv_shape = jax.ShapeDtypeStruct((B, H, N, D), x.dtype)
    q, k, v = pl.pallas_call(
        _qkv_proj_kernel,
        out_shape=(qkv_shape, qkv_shape, qkv_shape),
        grid=(B, H, nS),
        in_specs=[
            pl.BlockSpec((None, TS, C), lambda b, h, s: (b, s, 0)),   # x (seq tile)
            pl.BlockSpec((None, C, D), lambda b, h, s: (h, 0, 0)),    # wq[h] (resident over s)
            pl.BlockSpec((None, C, D), lambda b, h, s: (h, 0, 0)),    # wk[h]
            pl.BlockSpec((None, C, D), lambda b, h, s: (h, 0, 0)),    # wv[h]
            pl.BlockSpec((None, 1, D), lambda b, h, s: (h, 0, 0)),    # bq[h]
            pl.BlockSpec((None, 1, D), lambda b, h, s: (h, 0, 0)),    # bk[h]
            pl.BlockSpec((None, 1, D), lambda b, h, s: (h, 0, 0)),    # bv[h]
        ],
        out_specs=(
            pl.BlockSpec((None, None, TS, D), lambda b, h, s: (b, h, s, 0)),
            pl.BlockSpec((None, None, TS, D), lambda b, h, s: (b, h, s, 0)),
            pl.BlockSpec((None, None, TS, D), lambda b, h, s: (b, h, s, 0)),
        ),
        compiler_params=pltpu.CompilerParams(
            dimension_semantics=("parallel", "parallel", "arbitrary"),
            vmem_limit_bytes=_VMEM_LIMIT),
    )(x, wq, wk, wv, bq, bk, bv)

    # ---- stage 2: flash attention + output projection ----
    TQ = _pick_block(N, 128)
    TK = _pick_block(N, 256)
    nQ, nK = N // TQ, N // TK

    out_padded = pl.pallas_call(
        _flash_attn_kernel,
        out_shape=jax.ShapeDtypeStruct((B, N, C_pad), x.dtype),
        grid=(B, nQ, nK),
        in_specs=[
            pl.BlockSpec((None, H, TQ, D), lambda b, qi, kj: (b, 0, qi, 0)),  # q
            pl.BlockSpec((None, H, TK, D), lambda b, qi, kj: (b, 0, kj, 0)),  # k
            pl.BlockSpec((None, H, TK, D), lambda b, qi, kj: (b, 0, kj, 0)),  # v
            pl.BlockSpec((H, D, C_pad), lambda b, qi, kj: (0, 0, 0)),         # w_proj (per-head)
            pl.BlockSpec((1, C_pad), lambda b, qi, kj: (0, 0)),               # b_proj
        ],
        out_specs=pl.BlockSpec((None, TQ, C_pad), lambda b, qi, kj: (b, qi, 0)),
        scratch_shapes=[
            pltpu.VMEM((H, TQ, 1), jnp.float32),   # running max
            pltpu.VMEM((H, TQ, 1), jnp.float32),   # running denom
            pltpu.VMEM((H, TQ, D), jnp.float32),   # output accumulator
        ],
        compiler_params=pltpu.CompilerParams(
            dimension_semantics=("parallel", "parallel", "arbitrary"),
            vmem_limit_bytes=_VMEM_LIMIT),
    )(q, k, v, wp, bp)

    if C_pad != C:
        return out_padded[..., :C]
    return out_padded


# --------------------------------------------------------------------------- #
# Pure-JAX reference mirroring the PyTorch forward (eval mode).
# --------------------------------------------------------------------------- #
def _reference(x, w_qkv, b_qkv, w_proj, b_proj, num_heads):
    B, N, C = x.shape
    D = C // num_heads
    qkv = x @ w_qkv + b_qkv                                       # (B, N, 3C)
    qkv = qkv.reshape(B, N, 3, num_heads, D).transpose(2, 0, 3, 1, 4)
    q, k, v = qkv[0], qkv[1], qkv[2]                              # (B, H, N, D)
    attn = jnp.einsum("bhnd,bhmd->bhnm", q, k) * (D ** -0.5)
    attn = jax.nn.softmax(attn, axis=-1)
    out = jnp.einsum("bhnm,bhmd->bhnd", attn, v)                  # (B, H, N, D)
    out = out.transpose(0, 2, 1, 3).reshape(B, N, C)
    return out @ w_proj + b_proj


if __name__ == "__main__":
    # Config: hidden_dim=32, num_heads=4, seq=8, batch=2 (head_dim=8).
    B, N, C, H = 2, 8, 32, 4

    key = jax.random.PRNGKey(0)
    kx, kwq, kbq, kwp, kbp = jax.random.split(key, 5)

    x = jax.random.normal(kx, (B, N, C), dtype=jnp.float32)
    # Deterministic parameter init (scaled normals; synthetic, not a checkpoint).
    w_qkv = jax.random.normal(kwq, (C, 3 * C), dtype=jnp.float32) * (1.0 / jnp.sqrt(C))
    b_qkv = jax.random.normal(kbq, (3 * C,), dtype=jnp.float32) * 0.02
    w_proj = jax.random.normal(kwp, (C, C), dtype=jnp.float32) * (1.0 / jnp.sqrt(C))
    b_proj = jax.random.normal(kbp, (C,), dtype=jnp.float32) * 0.02

    out = standard_attention(x, w_qkv, b_qkv, w_proj, b_proj, num_heads=H)
    out = jax.block_until_ready(out)

    ref = _reference(x, w_qkv, b_qkv, w_proj, b_proj, H)
    assert out.shape == (B, N, C)
    # Tolerance loosened vs. exact math because of pl.reciprocal(approx=True).
    assert jnp.allclose(out, ref, atol=1e-2, rtol=1e-2), "Pallas kernel mismatch vs reference"

    print("KERNEL_OK")
</pallas_src>

<mosaic_0001>
module attributes {stable_mosaic.version = 11 : i64} {
  func.func @_qkv_proj_kernel(%arg0: i32, %arg1: i32, %arg2: i32, %arg3: memref<1x8x32xf32, #tpu.memory_space<vmem>>, %arg4: memref<1x32x8xf32, #tpu.memory_space<vmem>>, %arg5: memref<1x32x8xf32, #tpu.memory_space<vmem>>, %arg6: memref<1x32x8xf32, #tpu.memory_space<vmem>>, %arg7: memref<1x1x8xf32, #tpu.memory_space<vmem>>, %arg8: memref<1x1x8xf32, #tpu.memory_space<vmem>>, %arg9: memref<1x1x8xf32, #tpu.memory_space<vmem>>, %arg10: memref<1x1x8x8xf32, #tpu.memory_space<vmem>>, %arg11: memref<1x1x8x8xf32, #tpu.memory_space<vmem>>, %arg12: memref<1x1x8x8xf32, #tpu.memory_space<vmem>>) attributes {dimension_semantics = [#tpu.dimension_semantics<parallel>, #tpu.dimension_semantics<parallel>, #tpu.dimension_semantics<arbitrary>], iteration_bounds = array<i64: 2, 4, 1>, scalar_prefetch = 0 : i64, scratch_operands = 0 : i64, tpu.core_type = #tpu.core_type<tc>, window_params = [{transform_indices = @transform_0, window_bounds = array<i64: 1, 8, 32>}, {transform_indices = @transform_1, window_bounds = array<i64: 1, 32, 8>}, {transform_indices = @transform_2, window_bounds = array<i64: 1, 32, 8>}, {transform_indices = @transform_3, window_bounds = array<i64: 1, 32, 8>}, {transform_indices = @transform_4, window_bounds = array<i64: 1, 1, 8>}, {transform_indices = @transform_5, window_bounds = array<i64: 1, 1, 8>}, {transform_indices = @transform_6, window_bounds = array<i64: 1, 1, 8>}, {transform_indices = @transform_7, window_bounds = array<i64: 1, 1, 8, 8>}, {transform_indices = @transform_8, window_bounds = array<i64: 1, 1, 8, 8>}, {transform_indices = @transform_9, window_bounds = array<i64: 1, 1, 8, 8>}]} {
    %c0 = arith.constant 0 : index
    %c0_0 = arith.constant 0 : index
    %c0_1 = arith.constant 0 : index
    %0 = vector.load %arg3[%c0, %c0_0, %c0_1] : memref<1x8x32xf32, #tpu.memory_space<vmem>>, vector<1x8x32xf32>
    %1 = vector.shape_cast %0 : vector<1x8x32xf32> to vector<8x32xf32>
    %c0_2 = arith.constant 0 : index
    %c0_3 = arith.constant 0 : index
    %c0_4 = arith.constant 0 : index
    %2 = vector.load %arg4[%c0_2, %c0_3, %c0_4] : memref<1x32x8xf32, #tpu.memory_space<vmem>>, vector<1x32x8xf32>
    %3 = vector.shape_cast %2 : vector<1x32x8xf32> to vector<32x8xf32>
    %cst = arith.constant dense<0.000000e+00> : vector<8x8xf32>
    %4 = tpu.matmul %1, %3, %cst {dimension_numbers = #tpu.dot_dimension_numbers<[1], [0], [0], [1], [0, 0, 1, 1], [], []>} : vector<8x32xf32>, vector<32x8xf32>, vector<8x8xf32> -> vector<8x8xf32>
    %c0_5 = arith.constant 0 : index
    %c0_6 = arith.constant 0 : index
    %c0_7 = arith.constant 0 : index
    %5 = vector.load %arg7[%c0_5, %c0_6, %c0_7] : memref<1x1x8xf32, #tpu.memory_space<vmem>>, vector<1x1x8xf32>
    %6 = vector.shape_cast %5 : vector<1x1x8xf32> to vector<1x8xf32>
    %7 = vector.broadcast %6 : vector<1x8xf32> to vector<8x8xf32>
    %8 = arith.addf %4, %7 : vector<8x8xf32>
    %c0_8 = arith.constant 0 : index
    %c0_9 = arith.constant 0 : index
    %c0_10 = arith.constant 0 : index
    %c0_11 = arith.constant 0 : index
    %9 = vector.load %arg10[%c0_8, %c0_9, %c0_10, %c0_11] : memref<1x1x8x8xf32, #tpu.memory_space<vmem>>, vector<1x1x8x8xf32>
    %10 = vector.shape_cast %9 : vector<1x1x8x8xf32> to vector<8x8xf32>
    %11 = vector.shape_cast %8 : vector<8x8xf32> to vector<1x1x8x8xf32>
    tpu.vector_store %arg10[%c0_8, %c0_9, %c0_10, %c0_11], %11 {strides = array<i32>} : memref<1x1x8x8xf32, #tpu.memory_space<vmem>>, vector<1x1x8x8xf32>,
    %c0_12 = arith.constant 0 : index
    %c0_13 = arith.constant 0 : index
    %c0_14 = arith.constant 0 : index
    %12 = vector.load %arg5[%c0_12, %c0_13, %c0_14] : memref<1x32x8xf32, #tpu.memory_space<vmem>>, vector<1x32x8xf32>
    %13 = vector.shape_cast %12 : vector<1x32x8xf32> to vector<32x8xf32>
    %cst_15 = arith.constant dense<0.000000e+00> : vector<8x8xf32>
    %14 = tpu.matmul %1, %13, %cst_15 {dimension_numbers = #tpu.dot_dimension_numbers<[1], [0], [0], [1], [0, 0, 1, 1], [], []>} : vector<8x32xf32>, vector<32x8xf32>, vector<8x8xf32> -> vector<8x8xf32>
    %c0_16 = arith.constant 0 : index
    %c0_17 = arith.constant 0 : index
    %c0_18 = arith.constant 0 : index
    %15 = vector.load %arg8[%c0_16, %c0_17, %c0_18] : memref<1x1x8xf32, #tpu.memory_space<vmem>>, vector<1x1x8xf32>
    %16 = vector.shape_cast %15 : vector<1x1x8xf32> to vector<1x8xf32>
    %17 = vector.broadcast %16 : vector<1x8xf32> to vector<8x8xf32>
    %18 = arith.addf %14, %17 : vector<8x8xf32>
    %c0_19 = arith.constant 0 : index
    %c0_20 = arith.constant 0 : index
    %c0_21 = arith.constant 0 : index
    %c0_22 = arith.constant 0 : index
    %19 = vector.load %arg11[%c0_19, %c0_20, %c0_21, %c0_22] : memref<1x1x8x8xf32, #tpu.memory_space<vmem>>, vector<1x1x8x8xf32>
    %20 = vector.shape_cast %19 : vector<1x1x8x8xf32> to vector<8x8xf32>
    %21 = vector.shape_cast %18 : vector<8x8xf32> to vector<1x1x8x8xf32>
    tpu.vector_store %arg11[%c0_19, %c0_20, %c0_21, %c0_22], %21 {strides = array<i32>} : memref<1x1x8x8xf32, #tpu.memory_space<vmem>>, vector<1x1x8x8xf32>,
    %c0_23 = arith.constant 0 : index
    %c0_24 = arith.constant 0 : index
    %c0_25 = arith.constant 0 : index
    %22 = vector.load %arg6[%c0_23, %c0_24, %c0_25] : memref<1x32x8xf32, #tpu.memory_space<vmem>>, vector<1x32x8xf32>
    %23 = vector.shape_cast %22 : vector<1x32x8xf32> to vector<32x8xf32>
    %cst_26 = arith.constant dense<0.000000e+00> : vector<8x8xf32>
    %24 = tpu.matmul %1, %23, %cst_26 {dimension_numbers = #tpu.dot_dimension_numbers<[1], [0], [0], [1], [0, 0, 1, 1], [], []>} : vector<8x32xf32>, vector<32x8xf32>, vector<8x8xf32> -> vector<8x8xf32>
    %c0_27 = arith.constant 0 : index
    %c0_28 = arith.constant 0 : index
    %c0_29 = arith.constant 0 : index
    %25 = vector.load %arg9[%c0_27, %c0_28, %c0_29] : memref<1x1x8xf32, #tpu.memory_space<vmem>>, vector<1x1x8xf32>
    %26 = vector.shape_cast %25 : vector<1x1x8xf32> to vector<1x8xf32>
    %27 = vector.broadcast %26 : vector<1x8xf32> to vector<8x8xf32>
    %28 = arith.addf %24, %27 : vector<8x8xf32>
    %c0_30 = arith.constant 0 : index
    %c0_31 = arith.constant 0 : index
    %c0_32 = arith.constant 0 : index
    %c0_33 = arith.constant 0 : index
    %29 = vector.load %arg12[%c0_30, %c0_31, %c0_32, %c0_33] : memref<1x1x8x8xf32, #tpu.memory_space<vmem>>, vector<1x1x8x8xf32>
    %30 = vector.shape_cast %29 : vector<1x1x8x8xf32> to vector<8x8xf32>
    %31 = vector.shape_cast %28 : vector<8x8xf32> to vector<1x1x8x8xf32>
    tpu.vector_store %arg12[%c0_30, %c0_31, %c0_32, %c0_33], %31 {strides = array<i32>} : memref<1x1x8x8xf32, #tpu.memory_space<vmem>>, vector<1x1x8x8xf32>,
    return
  }
  func.func @transform_0(%arg0: i32, %arg1: i32, %arg2: i32) -> (i32, i32, i32) {
    %c0_i32 = arith.constant 0 : i32
    %c0_i32_0 = arith.constant 0 : i32
    return %arg0, %arg2, %c0_i32 : i32, i32, i32
  }
  func.func @transform_1(%arg0: i32, %arg1: i32, %arg2: i32) -> (i32, i32, i32) {
    %c0_i32 = arith.constant 0 : i32
    %c0_i32_0 = arith.constant 0 : i32
    %c0_i32_1 = arith.constant 0 : i32
    return %arg1, %c0_i32, %c0_i32_0 : i32, i32, i32
  }
  func.func @transform_2(%arg0: i32, %arg1: i32, %arg2: i32) -> (i32, i32, i32) {
    %c0_i32 = arith.constant 0 : i32
    %c0_i32_0 = arith.constant 0 : i32
    %c0_i32_1 = arith.constant 0 : i32
    return %arg1, %c0_i32, %c0_i32_0 : i32, i32, i32
  }
  func.func @transform_3(%arg0: i32, %arg1: i32, %arg2: i32) -> (i32, i32, i32) {
    %c0_i32 = arith.constant 0 : i32
    %c0_i32_0 = arith.constant 0 : i32
    %c0_i32_1 = arith.constant 0 : i32
    return %arg1, %c0_i32, %c0_i32_0 : i32, i32, i32
  }
  func.func @transform_4(%arg0: i32, %arg1: i32, %arg2: i32) -> (i32, i32, i32) {
    %c0_i32 = arith.constant 0 : i32
    %c0_i32_0 = arith.constant 0 : i32
    %c0_i32_1 = arith.constant 0 : i32
    return %arg1, %c0_i32, %c0_i32_0 : i32, i32, i32
  }
  func.func @transform_5(%arg0: i32, %arg1: i32, %arg2: i32) -> (i32, i32, i32) {
    %c0_i32 = arith.constant 0 : i32
    %c0_i32_0 = arith.constant 0 : i32
    %c0_i32_1 = arith.constant 0 : i32
    return %arg1, %c0_i32, %c0_i32_0 : i32, i32, i32
  }
  func.func @transform_6(%arg0: i32, %arg1: i32, %arg2: i32) -> (i32, i32, i32) {
    %c0_i32 = arith.constant 0 : i32
    %c0_i32_0 = arith.constant 0 : i32
    %c0_i32_1 = arith.constant 0 : i32
    return %arg1, %c0_i32, %c0_i32_0 : i32, i32, i32
  }
  func.func @transform_7(%arg0: i32, %arg1: i32, %arg2: i32) -> (i32, i32, i32, i32) {
    %c0_i32 = arith.constant 0 : i32
    %c0_i32_0 = arith.constant 0 : i32
    return %arg0, %arg1, %arg2, %c0_i32 : i32, i32, i32, i32
  }
  func.func @transform_8(%arg0: i32, %arg1: i32, %arg2: i32) -> (i32, i32, i32, i32) {
    %c0_i32 = arith.constant 0 : i32
    %c0_i32_0 = arith.constant 0 : i32
    return %arg0, %arg1, %arg2, %c0_i32 : i32, i32, i32, i32
  }
  func.func @transform_9(%arg0: i32, %arg1: i32, %arg2: i32) -> (i32, i32, i32, i32) {
    %c0_i32 = arith.constant 0 : i32
    %c0_i32_0 = arith.constant 0 : i32
    return %arg0, %arg1, %arg2, %c0_i32 : i32, i32, i32, i32
  }
}

module attributes {stable_mosaic.version = 11 : i64} {
  func.func @_flash_attn_kernel(%arg0: i32, %arg1: i32, %arg2: i32, %arg3: memref<1x4x8x8xf32, #tpu.memory_space<vmem>>, %arg4: memref<1x4x8x8xf32, #tpu.memory_space<vmem>>, %arg5: memref<1x4x8x8xf32, #tpu.memory_space<vmem>>, %arg6: memref<4x8x128xf32, #tpu.memory_space<vmem>>, %arg7: memref<1x128xf32, #tpu.memory_space<vmem>>, %arg8: memref<1x8x128xf32, #tpu.memory_space<vmem>>, %arg9: memref<4x8x1xf32, #tpu.memory_space<vmem>>, %arg10: memref<4x8x1xf32, #tpu.memory_space<vmem>>, %arg11: memref<4x8x8xf32, #tpu.memory_space<vmem>>) attributes {dimension_semantics = [#tpu.dimension_semantics<parallel>, #tpu.dimension_semantics<parallel>, #tpu.dimension_semantics<arbitrary>], iteration_bounds = array<i64: 2, 1, 1>, scalar_prefetch = 0 : i64, scratch_operands = 3 : i64, tpu.core_type = #tpu.core_type<tc>, window_params = [{transform_indices = @transform_0, window_bounds = array<i64: 1, 4, 8, 8>}, {transform_indices = @transform_1, window_bounds = array<i64: 1, 4, 8, 8>}, {transform_indices = @transform_2, window_bounds = array<i64: 1, 4, 8, 8>}, {pipeline_mode = #tpu.pipeline_mode<synchronous>, transform_indices = @transform_3, window_bounds = array<i64: 4, 8, 128>}, {pipeline_mode = #tpu.pipeline_mode<synchronous>, transform_indices = @transform_4, window_bounds = array<i64: 1, 128>}, {transform_indices = @transform_5, window_bounds = array<i64: 1, 8, 128>}]} {
    %c0_i32 = arith.constant 0 : i32
    %0 = arith.cmpi eq, %arg2, %c0_i32 : i32
    %1 = arith.extui %0 : i1 to i32
    %c0_i32_0 = arith.constant 0 : i32
    %2 = arith.cmpi ne, %1, %c0_i32_0 : i32
    scf.if %2 {
      %cst_35 = arith.constant 0xFF800000 : f32
      %35 = vector.broadcast %cst_35 : f32 to vector<4x8x1xf32>
      %c0_36 = arith.constant 0 : index
      %c0_37 = arith.constant 0 : index
      %c0_38 = arith.constant 0 : index
      %36 = vector.load %arg9[%c0_36, %c0_37, %c0_38] : memref<4x8x1xf32, #tpu.memory_space<vmem>>, vector<4x8x1xf32>
      tpu.vector_store %arg9[%c0_36, %c0_37, %c0_38], %35 {strides = array<i32>} : memref<4x8x1xf32, #tpu.memory_space<vmem>>, vector<4x8x1xf32>,
      %cst_39 = arith.constant 0.000000e+00 : f32
      %37 = vector.broadcast %cst_39 : f32 to vector<4x8x1xf32>
      %c0_40 = arith.constant 0 : index
      %c0_41 = arith.constant 0 : index
      %c0_42 = arith.constant 0 : index
      %38 = vector.load %arg10[%c0_40, %c0_41, %c0_42] : memref<4x8x1xf32, #tpu.memory_space<vmem>>, vector<4x8x1xf32>
      tpu.vector_store %arg10[%c0_40, %c0_41, %c0_42], %37 {strides = array<i32>} : memref<4x8x1xf32, #tpu.memory_space<vmem>>, vector<4x8x1xf32>,
      %cst_43 = arith.constant 0.000000e+00 : f32
      %39 = vector.broadcast %cst_43 : f32 to vector<4x8x8xf32>
      %c0_44 = arith.constant 0 : index
      %c0_45 = arith.constant 0 : index
      %c0_46 = arith.constant 0 : index
      %40 = vector.load %arg11[%c0_44, %c0_45, %c0_46] : memref<4x8x8xf32, #tpu.memory_space<vmem>>, vector<4x8x8xf32>
      tpu.vector_store %arg11[%c0_44, %c0_45, %c0_46], %39 {strides = array<i32>} : memref<4x8x8xf32, #tpu.memory_space<vmem>>, vector<4x8x8xf32>,
    } else {
    }
    %c0 = arith.constant 0 : index
    %c0_1 = arith.constant 0 : index
    %c0_2 = arith.constant 0 : index
    %c0_3 = arith.constant 0 : index
    %3 = vector.load %arg3[%c0, %c0_1, %c0_2, %c0_3] : memref<1x4x8x8xf32, #tpu.memory_space<vmem>>, vector<1x4x8x8xf32>
    %4 = vector.shape_cast %3 : vector<1x4x8x8xf32> to vector<4x8x8xf32>
    %c0_4 = arith.constant 0 : index
    %c0_5 = arith.constant 0 : index
    %c0_6 = arith.constant 0 : index
    %c0_7 = arith.constant 0 : index
    %5 = vector.load %arg4[%c0_4, %c0_5, %c0_6, %c0_7] : memref<1x4x8x8xf32, #tpu.memory_space<vmem>>, vector<1x4x8x8xf32>
    %6 = vector.shape_cast %5 : vector<1x4x8x8xf32> to vector<4x8x8xf32>
    %c0_8 = arith.constant 0 : index
    %c0_9 = arith.constant 0 : index
    %c0_10 = arith.constant 0 : index
    %c0_11 = arith.constant 0 : index
    %7 = vector.load %arg5[%c0_8, %c0_9, %c0_10, %c0_11] : memref<1x4x8x8xf32, #tpu.memory_space<vmem>>, vector<1x4x8x8xf32>
    %8 = vector.shape_cast %7 : vector<1x4x8x8xf32> to vector<4x8x8xf32>
    "tpu.trace_start"() <{level = 10 : i32, message = "hqd,hkd->hqk"}> : () -> ()
    %cst = arith.constant dense<0.000000e+00> : vector<4x8x8xf32>
    %9 = tpu.matmul %4, %6, %cst {dimension_numbers = #tpu.dot_dimension_numbers<[2], [2], [1], [1], [0, 0, 0, 1, 1, 1], [0], [0]>} : vector<4x8x8xf32>, vector<4x8x8xf32>, vector<4x8x8xf32> -> vector<4x8x8xf32>
    "tpu.trace_stop"() : () -> ()
    %c0_12 = arith.constant 0 : index
    %c0_13 = arith.constant 0 : index
    %c0_14 = arith.constant 0 : index
    %10 = vector.load %arg9[%c0_12, %c0_13, %c0_14] : memref<4x8x1xf32, #tpu.memory_space<vmem>>, vector<4x8x1xf32>
    %cst_15 = arith.constant dense<0xFF800000> : vector<4x8xf32>
    %11 = vector.multi_reduction <maximumf>, %9, %cst_15 [2] : vector<4x8x8xf32> to vector<4x8xf32>
    %12 = vector.shape_cast %11 : vector<4x8xf32> to vector<4x8x1xf32>
    %13 = arith.maximumf %10, %12 : vector<4x8x1xf32>
    %14 = arith.subf %10, %13 : vector<4x8x1xf32>
    %15 = math.exp %14 : vector<4x8x1xf32>
    %16 = vector.broadcast %13 : vector<4x8x1xf32> to vector<4x8x8xf32>
    %17 = arith.subf %9, %16 : vector<4x8x8xf32>
    %18 = math.exp %17 : vector<4x8x8xf32>
    %c0_16 = arith.constant 0 : index
    %c0_17 = arith.constant 0 : index
    %c0_18 = arith.constant 0 : index
    %19 = vector.load %arg10[%c0_16, %c0_17, %c0_18] : memref<4x8x1xf32, #tpu.memory_space<vmem>>, vector<4x8x1xf32>
    %20 = arith.mulf %15, %19 : vector<4x8x1xf32>
    %cst_19 = arith.constant dense<0.000000e+00> : vector<4x8xf32>
    %21 = vector.multi_reduction <add>, %18, %cst_19 [2] : vector<4x8x8xf32> to vector<4x8xf32>
    %22 = vector.shape_cast %21 : vector<4x8xf32> to vector<4x8x1xf32>
    %23 = arith.addf %20, %22 : vector<4x8x1xf32>
    %c0_20 = arith.constant 0 : index
    %c0_21 = arith.constant 0 : index
    %c0_22 = arith.constant 0 : index
    %24 = vector.load %arg10[%c0_20, %c0_21, %c0_22] : memref<4x8x1xf32, #tpu.memory_space<vmem>>, vector<4x8x1xf32>
    tpu.vector_store %arg10[%c0_20, %c0_21, %c0_22], %23 {strides = array<i32>} : memref<4x8x1xf32, #tpu.memory_space<vmem>>, vector<4x8x1xf32>,
    %c0_23 = arith.constant 0 : index
    %c0_24 = arith.constant 0 : index
    %c0_25 = arith.constant 0 : index
    %25 = vector.load %arg11[%c0_23, %c0_24, %c0_25] : memref<4x8x8xf32, #tpu.memory_space<vmem>>, vector<4x8x8xf32>
    %26 = vector.broadcast %15 : vector<4x8x1xf32> to vector<4x8x8xf32>
    %27 = arith.mulf %26, %25 : vector<4x8x8xf32>
    "tpu.trace_start"() <{level = 10 : i32, message = "hqk,hkd->hqd"}> : () -> ()
    %cst_26 = arith.constant dense<0.000000e+00> : vector<4x8x8xf32>
    %28 = tpu.matmul %18, %8, %cst_26 {dimension_numbers = #tpu.dot_dimension_numbers<[2], [1], [1], [2], [0, 0, 0, 1, 1, 2], [0], [0]>} : vector<4x8x8xf32>, vector<4x8x8xf32>, vector<4x8x8xf32> -> vector<4x8x8xf32>
    "tpu.trace_stop"() : () -> ()
    %29 = arith.addf %27, %28 : vector<4x8x8xf32>
    %c0_27 = arith.constant 0 : index
    %c0_28 = arith.constant 0 : index
    %c0_29 = arith.constant 0 : index
    %30 = vector.load %arg11[%c0_27, %c0_28, %c0_29] : memref<4x8x8xf32, #tpu.memory_space<vmem>>, vector<4x8x8xf32>
    tpu.vector_store %arg11[%c0_27, %c0_28, %c0_29], %29 {strides = array<i32>} : memref<4x8x8xf32, #tpu.memory_space<vmem>>, vector<4x8x8xf32>,
    %c0_30 = arith.constant 0 : index
    %c0_31 = arith.constant 0 : index
    %c0_32 = arith.constant 0 : index
    %31 = vector.load %arg9[%c0_30, %c0_31, %c0_32] : memref<4x8x1xf32, #tpu.memory_space<vmem>>, vector<4x8x1xf32>
    tpu.vector_store %arg9[%c0_30, %c0_31, %c0_32], %13 {strides = array<i32>} : memref<4x8x1xf32, #tpu.memory_space<vmem>>, vector<4x8x1xf32>,
    %c0_i32_33 = arith.constant 0 : i32
    %32 = arith.cmpi eq, %arg2, %c0_i32_33 : i32
    %33 = arith.extui %32 : i1 to i32
    %c0_i32_34 = arith.constant 0 : i32
    %34 = arith.cmpi ne, %33, %c0_i32_34 : i32
    scf.if %34 {
      %c0_35 = arith.constant 0 : index
      %c0_36 = arith.constant 0 : index
      %c0_37 = arith.constant 0 : index
      %35 = vector.load %arg11[%c0_35, %c0_36, %c0_37] : memref<4x8x8xf32, #tpu.memory_space<vmem>>, vector<4x8x8xf32>
      %c0_38 = arith.constant 0 : index
      %c0_39 = arith.constant 0 : index
      %c0_40 = arith.constant 0 : index
      %36 = vector.load %arg10[%c0_38, %c0_39, %c0_40] : memref<4x8x1xf32, #tpu.memory_space<vmem>>, vector<4x8x1xf32>
      %37 = tpu.reciprocal %36 {approx = true} : vector<4x8x1xf32> -> vector<4x8x1xf32>
      %38 = vector.broadcast %37 : vector<4x8x1xf32> to vector<4x8x8xf32>
      %39 = arith.mulf %35, %38 : vector<4x8x8xf32>
      %c0_41 = arith.constant 0 : index
      %c0_42 = arith.constant 0 : index
      %c0_43 = arith.constant 0 : index
      %40 = vector.load %arg6[%c0_41, %c0_42, %c0_43] : memref<4x8x128xf32, #tpu.memory_space<vmem>>, vector<4x8x128xf32>
      "tpu.trace_start"() <{level = 10 : i32, message = "hqd,hdc->hqc"}> : () -> ()
      %cst_44 = arith.constant dense<0.000000e+00> : vector<4x8x128xf32>
      %41 = tpu.matmul %39, %40, %cst_44 {dimension_numbers = #tpu.dot_dimension_numbers<[2], [1], [1], [2], [0, 0, 0, 1, 1, 2], [0], [0]>} : vector<4x8x8xf32>, vector<4x8x128xf32>, vector<4x8x128xf32> -> vector<4x8x128xf32>
      "tpu.trace_stop"() : () -> ()
      %cst_45 = arith.constant dense<0.000000e+00> : vector<8x128xf32>
      %42 = vector.multi_reduction <add>, %41, %cst_45 [0] : vector<4x8x128xf32> to vector<8x128xf32>
      %c0_46 = arith.constant 0 : index
      %c0_47 = arith.constant 0 : index
      %43 = vector.load %arg7[%c0_46, %c0_47] : memref<1x128xf32, #tpu.memory_space<vmem>>, vector<1x128xf32>
      %44 = vector.shape_cast %43 : vector<1x128xf32> to vector<128xf32>
      %45 = vector.shape_cast %44 : vector<128xf32> to vector<1x128xf32>
      %46 = vector.broadcast %45 : vector<1x128xf32> to vector<8x128xf32>
      %47 = arith.addf %42, %46 : vector<8x128xf32>
      %c0_48 = arith.constant 0 : index
      %c0_49 = arith.constant 0 : index
      %c0_50 = arith.constant 0 : index
      %48 = vector.load %arg8[%c0_48, %c0_49, %c0_50] : memref<1x8x128xf32, #tpu.memory_space<vmem>>, vector<1x8x128xf32>
      %49 = vector.shape_cast %48 : vector<1x8x128xf32> to vector<8x128xf32>
      %50 = vector.shape_cast %47 : vector<8x128xf32> to vector<1x8x128xf32>
      tpu.vector_store %arg8[%c0_48, %c0_49, %c0_50], %50 {strides = array<i32>} : memref<1x8x128xf32, #tpu.memory_space<vmem>>, vector<1x8x128xf32>,
    } else {
    }
    return
  }
  func.func @transform_0(%arg0: i32, %arg1: i32, %arg2: i32) -> (i32, i32, i32, i32) {
    %c0_i32 = arith.constant 0 : i32
    %c0_i32_0 = arith.constant 0 : i32
    %c0_i32_1 = arith.constant 0 : i32
    return %arg0, %c0_i32, %arg1, %c0_i32_0 : i32, i32, i32, i32
  }
  func.func @transform_1(%arg0: i32, %arg1: i32, %arg2: i32) -> (i32, i32, i32, i32) {
    %c0_i32 = arith.constant 0 : i32
    %c0_i32_0 = arith.constant 0 : i32
    %c0_i32_1 = arith.constant 0 : i32
    return %arg0, %c0_i32, %arg2, %c0_i32_0 : i32, i32, i32, i32
  }
  func.func @transform_2(%arg0: i32, %arg1: i32, %arg2: i32) -> (i32, i32, i32, i32) {
    %c0_i32 = arith.constant 0 : i32
    %c0_i32_0 = arith.constant 0 : i32
    %c0_i32_1 = arith.constant 0 : i32
    return %arg0, %c0_i32, %arg2, %c0_i32_0 : i32, i32, i32, i32
  }
  func.func @transform_3(%arg0: i32, %arg1: i32, %arg2: i32) -> (i32, i32, i32) {
    %c0_i32 = arith.constant 0 : i32
    %c0_i32_0 = arith.constant 0 : i32
    %c0_i32_1 = arith.constant 0 : i32
    %c0_i32_2 = arith.constant 0 : i32
    return %c0_i32, %c0_i32_0, %c0_i32_1 : i32, i32, i32
  }
  func.func @transform_4(%arg0: i32, %arg1: i32, %arg2: i32) -> (i32, i32) {
    %c0_i32 = arith.constant 0 : i32
    %c0_i32_0 = arith.constant 0 : i32
    %c0_i32_1 = arith.constant 0 : i32
    return %c0_i32, %c0_i32_0 : i32, i32
  }
  func.func @transform_5(%arg0: i32, %arg1: i32, %arg2: i32) -> (i32, i32, i32) {
    %c0_i32 = arith.constant 0 : i32
    %c0_i32_0 = arith.constant 0 : i32
    return %arg0, %arg1, %c0_i32 : i32, i32, i32
  }
}

</mosaic_0001>

<bundles_post_ra>
// kernel: standard_attention.2
= control target key start
LH: loop header
LB: loop body
LE: loop exit
PB: predicated region body
PF: predicated region fallthrough
CT: control target
= control target key end

     0   :  { %s1060_s30 = smov 0   ;;  %s1062_s10 = smov 0   ;;  %s1147_s0 = inlined_call_operand.vmem [shape: f32[2,8,32], index: 0, kind: input, shape index: {}]   ;;  %s1148_s1 = inlined_call_operand.vmem [shape: f32[4,32,8], index: 1, kind: input, shape index: {}]   ;;  %s1149_s2 = inlined_call_operand.vmem [shape: f32[4,32,8], index: 2, kind: input, shape index: {}]   ;;  %s1150_s3 = inlined_call_operand.vmem [shape: f32[4,32,8], index: 3, kind: input, shape index: {}]   ;;  %s1151_s4 = inlined_call_operand.vmem [shape: f32[4,1,8], index: 4, kind: input, shape index: {}]   ;;  %s1152_s5 = inlined_call_operand.vmem [shape: f32[4,1,8], index: 5, kind: input, shape index: {}]   ;;  %s1153_s6 = inlined_call_operand.vmem [shape: f32[4,1,8], index: 6, kind: input, shape index: {}]   ;;  %s1154_s7 = inlined_call_operand.vmem [shape: f32[2,4,8,8], index: 7, kind: output, shape index: {0}]   ;;  %s1155_s8 = inlined_call_operand.vmem [shape: f32[2,4,8,8], index: 8, kind: output, shape index: {1}]   ;;  %s1156_s9 = inlined_call_operand.vmem [shape: f32[2,4,8,8], index: 9, kind: output, shape index: {2}]  }
   0x1   :  { %s1064_s11 = smov 0   ;;  %s1066_s12 = smov 0  }
   0x2   :  { %s1068_s13 = smov 0  }
   0x3 LB: > { %s35_s14 = sadd.s32 1, %s1000_s11  ;;  %s39_s15 = sadd.s32 1, %s1004_s12  ;;  %s1008_s13 = sphi %s1068_s13, %s20_s13   ;;  %s1004_s12 = sphi %s1066_s12, %s1160_s12   ;;  %s1000_s11 = sphi %s1064_s11, %s1159_s11   ;;  %s996_s10 = sphi %s1062_s10, %s1158_s10   ;;  %s992_s30 = sphi %s1060_s30, %s1157_s30  }
   0x4   : > { %p37_p0 = scmp.ge.s32.totalorder %s35_s14, 4  ;;  %p905_p1 = scmp.ge.s32.totalorder %s1008_s13, 1 }
   0x5   : > { %p381_p2 = scmp.lt.s32.totalorder %s1008_s13, 9 }
   0x6   : > { %s1162_s14 = smov (%p37_p0, %s35_s14), 0  ;;  %s1164_s15 = smov (!%p37_p0, %s39_s15), %s1004_s12 }
   0x7   : > { %p382_p3 = pnand %p905_p1, %p381_p2  ;;  %p41_p4 = scmp.ge.s32.totalorder %s1164_s15, 2 }
   0x8   : > { %p478_p5 = scmp.lt.s32.totalorder (!%p382_p3), %s992_s30, 3  ;;  %p471_p6 = scmp.lt.s32.totalorder (!%p382_p3), %s996_s10, 1 }
   0x9   : > { %s1166_s15 = smov (%p41_p4, %s1164_s15), 0  ;;  %385 = sbr.rel (%p382_p3) target bundleno = 160 (0xa0), region = 48 }
   0xe   : > { %s1168_s30 = smov (!%p478_p5, %s992_s30), 3  ;;  %s1170_s10 = smov (!%p471_p6, %s996_s10), 1  ;;  %vm544_vm0 = vcmask 261120   ;;  %vm568_vm1 = vcmask 64512  }
   0xf   : > { %s924_s16 = sshll.u32 %s1168_s30, 5  ;;  %s495_s19 = scalar_lea.vmem %s1151_s4, %s1168_s30 }
  0x10   : > { %s492_s22 = scalar_lea.vmem %s1150_s3, %s924_s16  ;;  %s482_s25 = scalar_lea.vmem %s1148_s1, %s924_s16  ;;  %v967_v13 = vld [vmem:[%s495_s19] ss:$0 sm:$0xff] }
  0x11   : > { %v602_v0 = vld [vmem:[%s492_s22 + $0x18] sm:$0xff]  ;;  %v601_v1 = vld [vmem:[%s492_s22 + $0x10] sm:$0xff]  ;;  %s487_s28 = scalar_lea.vmem %s1149_s2, %s924_s16  ;;  %s906_s29 = sshll.u32 %s1170_s10, 3  ;;  %v600_v4 = vld [vmem:[%s492_s22 + $0x8] sm:$0xff] }
  0x12   : > { %619 = vmatpush.msra.mxu2 %v602_v0  ;;  %v539_v2 = vld [vmem:[%s482_s25 + $0x18] sm:$0xff]  ;;  %s913_s17 = sshll.u32 %s1170_s10, 2  ;;  %s477_s21 = scalar_lea.vmem %s1147_s0, %s906_s29  ;;  %v538_v5 = vld [vmem:[%s482_s25 + $0x10] sm:$0xff]  ;;  %v537_v7 = vld [vmem:[%s482_s25 + $0x8] sm:$0xff] }
  0x13   : > { %v573_v3 = vld [vmem:[%s487_s28 + $0x18] sm:$0xff]  ;;  %560 = vmatpush.msra.mxu0 %v539_v2  ;;  %s510_s23 = sadd.s32 %s913_s17, %s1168_s30  ;;  %v572_v6 = vld [vmem:[%s487_s28 + $0x10] sm:$0xff]  ;;  %v571_v8 = vld [vmem:[%s487_s28 + $0x8] sm:$0xff]  ;;  %s501_s27 = scalar_lea.vmem %s1153_s6, %s1168_s30 }
  0x14   : > { %590 = vmatpush.msra.mxu1 %v573_v3  ;;  %620 = vmatpush.msra.mxu2 %v601_v1  ;;  %v599_v9 = vld [vmem:[%s492_s22] sm:$0xff]  ;;  %s498_s22 = scalar_lea.vmem %s1152_s5, %s1168_s30  ;;  %s914_s29 = sshll.u32 %s510_s23, 3 }
  0x15   : > { %561 = vmatpush.msra.mxu0 %v538_v5  ;;  %v535_v10 = vld [vmem:[%s477_s21] sm:$0xff]  ;;  %s512_s20 = scalar_lea.vmem %s1154_s7, %s914_s29  ;;  %s523_s16 = scalar_lea.vmem %s1155_s8, %s914_s29 }
  0x16   : > { %591 = vmatpush.msra.mxu1 %v572_v6  ;;  %621 = vmatpush.msra.mxu2 %v600_v4  ;;  %v536_v11 = vld [vmem:[%s482_s25] sm:$0xff]  ;;  %s534_s19 = scalar_lea.vmem %s1156_s9, %s914_s29 }
  0x17   : > { %562 = vmatpush.msra.mxu0 %v537_v7  ;;  %v570_v12 = vld [vmem:[%s487_s28] sm:$0xff] }
  0x18   : > { %592 = vmatpush.msra.mxu1 %v571_v8  ;;  %622 = vmatpush.msra.mxu2 %v599_v9  ;;  %v968_v14 = vld [vmem:[%s498_s22] ss:$0 sm:$0xff] }
  0x19   : > { %921 = vmatmul.msk.f32.vlgmr.msra.gmra.mxu2 %vm544_vm0, %v535_v10  ;;  %563 = vmatpush.msra.mxu0 %v536_v11  ;;  %v969_v19 = vld [vmem:[%s501_s27] ss:$0 sm:$0xff] }
  0x1a   : > { %593 = vmatpush.msra.mxu1 %v570_v12  ;;  %919 = vmatmul.msk.f32.vlgmr.msra.gmra.mxu0 %vm544_vm0, %v535_v10 }
  0x1b   : > { %920 = vmatmul.msk.f32.vlgmr.msra.gmra.mxu1 %vm544_vm0, %v535_v10 }
  0x97   : > { %v565_v15 = vpop.f32.mrf.mxu0 }
  0x98   : > { %v566_v16 = vadd.f32 %v967_v13, %v565_v15  ;;  %v595_v17 = vpop.f32.mrf.mxu1 }
  0x99   : > { %v596_v18 = vadd.f32 %v968_v14, %v595_v17 }
  0x9a   : > { %569 = vst.msk [vmem:[%s512_s20] sm:$0xff] %vm568_vm1, %v566_v16 }
  0x9b   : > { %598 = vst.msk [vmem:[%s523_s16] sm:$0xff] %vm568_vm1, %v596_v18 }
  0x9c   : > { %v624_v20 = vpop.f32.mrf.mxu2 }
  0x9d   : > { %v625_v21 = vadd.f32 %v969_v19, %v624_v20 }
  0x9f   : > { %627 = vst.msk [vmem:[%s534_s19] sm:$0xff] %vm568_vm1, %v625_v21 }
  0xa0 PF: > { %s20_s13 = sadd.s32 1, %s1008_s13   ;;  %s1157_s30 = smov %s1000_s11 }
  0xa1   : > { %p17_p7 = scmp.ge.s32.totalorder %s20_s13, 10   ;;  %s1158_s10 = smov %s1004_s12 }
  0xa2   : > { %s1159_s11 = smov %s1162_s14  ;;  %s1160_s12 = smov %s1166_s15 }
  0xa3   :  { %19 = sbr.rel (!%p17_p7) target bundleno = 3 (0x3), region = 120 }

// kernel: standard_attention.3
= control target key start
LH: loop header
LB: loop body
LE: loop exit
PB: predicated region body
PF: predicated region fallthrough
CT: control target
= control target key end

     0   :  { %10 = vsyncpa [#allocation6], 0  ;;  %s1384_s0 = inlined_call_operand.vmem [shape: f32[2,4,8,8], index: 0, kind: input, shape index: {}]   ;;  %s1385_s1 = inlined_call_operand.vmem [shape: f32[2,4,8,8], index: 1, kind: input, shape index: {}]   ;;  %s1386_s2 = inlined_call_operand.vmem [shape: f32[2,4,8,8], index: 2, kind: input, shape index: {}]   ;;  %s1387_s3 = inlined_call_operand.vmem [shape: f32[4,8,128], index: 3, kind: input, shape index: {}]   ;;  %s1388_s4 = inlined_call_operand.vmem [shape: f32[1,128], index: 4, kind: input, shape index: {}]   ;;  %s1389_s5 = inlined_call_operand.hbm [shape: f32[2,8,128], index: 5, kind: output, shape index: {}]  }
   0x1   :  { %12 = vsyncpa [#allocation6 + $0x1], 0  ;;  %s1185_s18 = smov 0   ;;  %s1187_s19 = smov 0  }
   0x2   :  { %s1189_s20 = smov 0   ;;  %s1191_s21 = smov 0  }
   0x3   :  { %s1193_s22 = smov 0   ;;  %s1195_s23 = smov 0  }
   0x4 LB: > { %s951_s24 = sadd.s32 4294967295, %s1150_s23   ;;  %s952_s25 = sadd.s32 4294967294, %s1150_s23   ;;  %s1150_s23 = sphi %s1195_s23, %s18_s23   ;;  %s1146_s22 = sphi %s1193_s22, %s1396_s22   ;;  %s1142_s21 = sphi %s1191_s21, %s1395_s21   ;;  %s1138_s20 = sphi %s1189_s20, %s1394_s20   ;;  %s1134_s19 = sphi %s1187_s19, %s1393_s19   ;;  %s1130_s18 = sphi %s1185_s18, %s1392_s18  }
   0x5   : > { %s37_s26 = sadd.s32 1, %s1146_s22  ;;  %s172_s27 = sadd.s32 1, %s1138_s20 }
   0x6   : > { %p39_p0 = scmp.ge.s32.totalorder %s37_s26, 2  ;;  %p182_p1 = scmp.ne.s32.totalorder %s1138_s20, %s1134_s19 }
   0x7   : > { %p183_p2 = scmp.eq.s32.totalorder %s951_s24, 1  ;;  %p188_p3 = scmp.ne.s32.totalorder %s1134_s19, %s1130_s18 }
   0x8   : > { %s1398_s26 = smov (%p39_p0, %s37_s26), 0  ;;  %p189_p5 = scmp.eq.s32.totalorder %s952_s25, 1 }
   0x9   : > { %p1225_p4 = por %p183_p2, %p182_p1  ;;  %s167_s29 = ssub.s32 %s1146_s22, %s1398_s26 }
   0xa   : > { %p955_p6 = scmp.ge.s32.totalorder %s1150_s23, 1  ;;  %p170_p7 = scmp.eq.s32.totalorder %s167_s29, 0 }
   0xb   : > { %p1232_p8 = por %p189_p5, %p188_p3  ;;  %p246_p9 = scmp.lt.s32.totalorder %s1150_s23, 3 }
   0xc   : > { %s1238_s6 = scalar_select %p170_p7, %s1138_s20, %s172_s27  }
   0xd   : > { %p247_p10 = pnand %p955_p6, %p246_p9 }
   0xe   : > { %p293_p11 = scmp.lt.s32.totalorder (!%p247_p10), %s1142_s21, 1  ;;  %s980_s13 = sshll.u32 (!%p247_p10), %s1142_s21, 3 }
   0xf   : > { %250 = sbr.rel (%p247_p10) target bundleno = 787 (0x313), region = 40  ;;  %s833_s16 = scalar_lea.hbm (!%p247_p10), %s1389_s5, %s980_s13 }
  0x10   : > { %s837_s29 = sshll.u32 (!%p247_p10), %s833_s16, 4  ;;  %s1092_s13 = scalar_lea.hbm (!%p247_p10), %s1389_s5, 16  ;;  %s838_s29 = int_to_ptr.hbm [resolvable:$true] %s837_s29 }
  0x14   : > { %s294_s7 = scalar_select %p293_p11, %s1142_s21, 1  ;;  %vm330_vm0 = vcmask 64512   ;;  %vm321_vm1 = vcmask 7168   ;;  %v1152_v8 = vmov -inf   ;;  %v1153_v17 = vmov 0  }
  0x15   : > { %322 = vst.msk [vmem:[#allocation2] sm:$0xff] %vm321_vm1, %v1152_v8  ;;  %1045 = vset.pattern.permute.xlu0 %v1153_v17  ;;  %1044 = vset.pattern.permute.xlu2 %v1153_v17  ;;  %v1154_v18 = vmov 0.0  }
  0x16   : > { %s1242_s8 = sshll.u32 %s294_s7, 5  ;;  %323 = vst.msk [vmem:[#allocation2 + $0x8] sm:$0xff] %vm321_vm1, %v1152_v8  ;;  %1046 = vset.pattern.permute.xlu1 %v1153_v17  ;;  %s1086_s7 = sshra.s32 %s838_s29, 4  ;;  %s1087_s7 = int_to_ptr.hbm [resolvable:$true] %s1086_s7 }
  0x17   : > { %s308_s11 = scalar_lea.vmem %s1385_s1, %s1242_s8  ;;  %s300_s14 = scalar_lea.vmem %s1384_s0, %s1242_s8  ;;  %324 = vst.msk [vmem:[#allocation2 + $0x10] sm:$0xff] %vm321_vm1, %v1152_v8 }
  0x18   : > { %v339_v0 = vld [vmem:[%s308_s11] sm:$0xff]  ;;  %v341_v1 = vld [vmem:[%s308_s11 + $0x10] sm:$0xff]  ;;  %v340_v4 = vld [vmem:[%s308_s11 + $0x8] sm:$0xff]  ;;  %325 = vst.msk [vmem:[#allocation2 + $0x18] sm:$0xff] %vm321_vm1, %v1152_v8  ;;  %s316_s17 = scalar_lea.vmem %s1386_s2, %s1242_s8  ;;  %s1088_s8 = scalar_lea.hbm %s1087_s7, 8 }
  0x19   : > { %v335_v2 = vld [vmem:[%s300_s14] sm:$0xff]  ;;  %963 = vmatpush.xpose.msk.msra.mxu0 %vm330_vm0, %v339_v0  ;;  %967 = vmatpush.xpose.msk.msra.mxu2 %vm330_vm0, %v341_v1  ;;  %v337_v3 = vld [vmem:[%s300_s14 + $0x10] sm:$0xff]  ;;  %v342_v5 = vld [vmem:[%s308_s11 + $0x18] sm:$0xff]  ;;  %328 = vst.msk [vmem:[#allocation3 + $0x10] sm:$0xff] %vm321_vm1, %v1154_v18  ;;  %s290_s11 = sand.u32 1, %s1134_s19   ;;  %p1089_p12 = scmp.ne.s32.totalorder %s1087_s7, %s1088_s8 }
  0x1a   : > { %965 = vmatpush.xpose.msk.msra.mxu1 %vm330_vm0, %v340_v4  ;;  %969 = vmatpush.xpose.msk.msra.mxu3 %vm330_vm0, %v342_v5  ;;  %v336_v6 = vld [vmem:[%s300_s14 + $0x8] sm:$0xff]  ;;  %v338_v7 = vld [vmem:[%s300_s14 + $0x18] sm:$0xff]  ;;  %326 = vst.msk [vmem:[#allocation3] sm:$0xff] %vm321_vm1, %v1154_v18  ;;  %v345_v35 = vld [vmem:[%s316_s17 + $0x10] sm:$0xff]  ;;  %s956_s12 = sshll.u32 %s290_s11, 3  ;;  %s822_s21 = scalar_lea.sflag [#allocation6], %s290_s11 }
  0x1b   : > { %327 = vst.msk [vmem:[#allocation3 + $0x8] sm:$0xff] %vm321_vm1, %v1154_v18  ;;  %v346_v36 = vld [vmem:[%s316_s17 + $0x18] sm:$0xff]  ;;  %v343_v37 = vld [vmem:[%s316_s17] sm:$0xff]  ;;  %v344_v38 = vld [vmem:[%s316_s17 + $0x8] sm:$0xff]  ;;  %s292_s25 = scalar_lea.vmem [#allocation5], %s956_s12  ;;  %p1090_p13 = pnand %p1089_p12, %p1225_p4 }
  0x1c   : > { %964 = vmatmul.msk.f32.vlgmr.msra.gmra.mxu0 %vm330_vm0, %v335_v2  ;;  %968 = vmatmul.msk.f32.vlgmr.msra.gmra.mxu2 %vm330_vm0, %v337_v3  ;;  %329 = vst.msk [vmem:[#allocation3 + $0x18] sm:$0xff] %vm321_vm1, %v1154_v18  ;;  %v1282_v19 = vld [vmem:[#allocation2] sm:$0xff]  ;;  %s835_s27 = sshll.u32 %s292_s25, 4  ;;  %p1093_p1 = scmp.lt.s32.totalorder %s1087_s7, %s1389_s5  ;;  %s836_s27 = int_to_ptr.vmem [resolvable:$true] %s835_s27 }
  0x1d   : > { %966 = vmatmul.msk.f32.vlgmr.msra.gmra.mxu1 %vm330_vm0, %v336_v6  ;;  %970 = vmatmul.msk.f32.vlgmr.msra.gmra.mxu3 %vm330_vm0, %v338_v7  ;;  %331 = vst.msk [vmem:[#allocation4] sm:$0xff] %vm330_vm0, %v1154_v18  ;;  %v1294_v25 = vld [vmem:[#allocation2 + $0x8] sm:$0xff]  ;;  %p1091_p0 = pneg %p1090_p13  ;;  %p1094_p2 = scmp.lt.s32.totalorder %s1092_s13, %s1088_s8 }
  0x1e   : > { %332 = vst.msk [vmem:[#allocation4 + $0x8] sm:$0xff] %vm330_vm0, %v1154_v18  ;;  %v1292_v23 = vld [vmem:[#allocation2 + $0x10] sm:$0xff]  ;;  %637 = vmatpush.msrb.mxu2 %v345_v35  ;;  %660 = vmatpush.msrb.mxu3 %v346_v36 }
  0x1f   : > { %333 = vst.msk [vmem:[#allocation4 + $0x10] sm:$0xff] %vm330_vm0, %v1154_v18  ;;  %v455_v31 = vld [vmem:[#allocation2 + $0x18] sm:$0xff]  ;;  %591 = vmatpush.msrb.mxu0 %v343_v37  ;;  %614 = vmatpush.msrb.mxu1 %v344_v38  ;;  %p1095_p3 = por %p1094_p2, %p1093_p1 }
  0x20   : > { %334 = vst.msk [vmem:[#allocation4 + $0x18] sm:$0xff] %vm330_vm0, %v1154_v18  ;;  %v518_v3 = vld [vmem:[#allocation3 + $0x10] sm:$0xff] }
  0x21   : > { %p1096_p5 = pnand %p1095_p3, %p1091_p0 }
  0x22   : > { %v517_v18 = vld [vmem:[#allocation3 + $0x8] sm:$0xff] }
  0x23   : > { %v519_v7 = vld [vmem:[#allocation3 + $0x18] sm:$0xff] }
  0x24   : > { %v545_v36 = vld [vmem:[#allocation4] sm:$0xff] }
  0x99   : > { %v1264_v9 = vpop.f32.mrf.mxu0 }
  0x9a   : > { %v456_v10 = vsel %vm330_vm0, %v1264_v9, -inf  ;;  %v1268_v11 = vpop.f32.mrf.mxu1 }
  0x9b   : > { %457 = vmax.xlane.f32.xlu1 %v456_v10  ;;  %v459_v14 = vsel %vm330_vm0, %v1268_v11, -inf }
  0x9f   : > { %v423_v12 = vpop.f32.mrf.mxu2 }
  0xa0   : > { %v462_v13 = vsel %vm330_vm0, %v423_v12, -inf  ;;  %v449_v15 = vpop.f32.mrf.mxu3 }
  0xa1   : > { %463 = vmax.xlane.f32.xlu0 %v462_v13  ;;  %v465_v16 = vsel %vm330_vm0, %v449_v15, -inf }
  0xa3   : > { %460 = vmax.xlane.f32.xlu1 %v459_v14 }
  0xa9   : > { %466 = vmax.xlane.f32.xlu0 %v465_v16 }
 0x10e   : > { %v458_v20 = vpop.xlane.xlu1 %457 }
 0x10f   : > { %v1285_v21 = vmax.f32 %v1282_v19, %v458_v20 }
 0x111   : > { %v472_v22 = vsub.f32 %v1282_v19, %v1285_v21  ;;  %673 = vst.msk [vmem:[#allocation2] sm:$0xff] %vm321_vm1, %v1285_v21  ;;  %486 = vperm.xlu0 %1045, %v1285_v21  }
 0x113   : > { %v476_v62 = vmul.f32 1.442695, %v472_v22 }
 0x114   : > { %v464_v24 = vpop.xlane.xlu0 %463 }
 0x115   : > { %v470_v26 = vmax.f32 %v1292_v23, %v464_v24  ;;  %v548_v24 = vld [vmem:[#allocation4 + $0x18] sm:$0xff] }
 0x116   : > { %v461_v27 = vpop.xlane.xlu1 %460 }
 0x117   : > { %v474_v28 = vsub.f32 %v1292_v23, %v470_v26  ;;  %675 = vst.msk [vmem:[#allocation2 + $0x10] sm:$0xff] %vm321_vm1, %v470_v26  ;;  %v469_v29 = vmax.f32 %v1294_v25, %v461_v27  ;;  %496 = vperm.xlu2 %1044, %v470_v26   ;;  %v547_v26 = vld [vmem:[#allocation4 + $0x10] sm:$0xff] }
 0x119   : > { %v473_v30 = vsub.f32 %v1294_v25, %v469_v29  ;;  %674 = vst.msk [vmem:[#allocation2 + $0x8] sm:$0xff] %vm321_vm1, %v469_v29  ;;  %491 = vperm.xlu1 %1046, %v469_v29   ;;  %v480_v61 = vmul.f32 1.442695, %v474_v28 }
 0x11b   : > { %v478_v0 = vmul.f32 1.442695, %v473_v30 }
 0x11c   : > { %v467_v32 = vpop.xlane.xlu0 %466 }
 0x11d   : > { %v471_v33 = vmax.f32 %v455_v31, %v467_v32 }
 0x11f   : > { %v475_v34 = vsub.f32 %v455_v31, %v471_v33  ;;  %676 = vst.msk [vmem:[#allocation2 + $0x18] sm:$0xff] %vm321_vm1, %v471_v33  ;;  %501 = vperm.xlu2 %1044, %v471_v33  }
 0x121   : > { %v482_v57 = vmul.f32 1.442695, %v475_v34 }
 0x171   : > { %v497_v39 = vpop.permute.xlu2 %496 }
 0x172   : > { %v506_v40 = vsub.f32 %v423_v12, %v497_v39  ;;  %v516_v12 = vld [vmem:[#allocation3] sm:$0xff] }
 0x174   : > { %v512_v41 = vmul.f32 1.442695, %v506_v40 }
 0x176   : > { %1048 = vpow2.f32 %v512_v41 }
 0x179   : > { %v502_v42 = vpop.permute.xlu2 %501 }
 0x17a   : > { %v507_v43 = vsub.f32 %v449_v15, %v502_v42  ;;  %v546_v42 = vld [vmem:[#allocation4 + $0x8] sm:$0xff] }
 0x17c   : > { %v1049_v44 = vpop.eup %1048  ;;  %v514_v45 = vmul.f32 1.442695, %v507_v43 }
 0x17d   : > { %973 = vmatmul.msk.f32.vlgmr.msrb.gmra.mxu2 %vm330_vm0, %v1049_v44  ;;  %v530_v46 = vsel %vm330_vm0, %v1049_v44, 0.0 }
 0x17e   : > { %1050 = vpow2.f32 %v514_v45  ;;  %531 = vadd.xlane.f32.xlu2 %v530_v46 }
 0x183   : > { %v487_v47 = vpop.permute.xlu0 %486 }
 0x184   : > { %v1051_v48 = vpop.eup %1050  ;;  %v504_v49 = vsub.f32 %v1264_v9, %v487_v47  ;;  %v719_v47 = vld [vmem:[%s1387_s3 + $0x18] sm:$0xff] }
 0x185   : > { %974 = vmatmul.msk.f32.vlgmr.msrb.gmra.mxu3 %vm330_vm0, %v1051_v48  ;;  %v533_v50 = vsel %vm330_vm0, %v1051_v48, 0.0  ;;  %v718_v48 = vld [vmem:[%s1387_s3 + $0x10] sm:$0xff] }
 0x186   : > { %v508_v51 = vmul.f32 1.442695, %v504_v49  ;;  %534 = vadd.xlane.f32.xlu1 %v533_v50  ;;  %807 = vmatpush.msra.mxu3 %v719_v47  ;;  %v717_v49 = vld [vmem:[%s1387_s3 + $0x8] sm:$0xff]  ;;  %v716_v50 = vld [vmem:[%s1387_s3] sm:$0xff] }
 0x187   : > { %784 = vmatpush.msra.mxu2 %v718_v48  ;;  %761 = vmatpush.msra.mxu1 %v717_v49 }
 0x188   : > { %1052 = vpow2.f32 %v508_v51  ;;  %738 = vmatpush.msra.mxu0 %v716_v50 }
 0x18b   : > { %v492_v52 = vpop.permute.xlu1 %491 }
 0x18c   : > { %v505_v53 = vsub.f32 %v1268_v11, %v492_v52 }
 0x18e   : > { %v1053_v54 = vpop.eup %1052  ;;  %v510_v55 = vmul.f32 1.442695, %v505_v53 }
 0x18f   : > { %971 = vmatmul.msk.f32.vlgmr.msrb.gmra.mxu0 %vm330_vm0, %v1053_v54  ;;  %v524_v56 = vsel %vm330_vm0, %v1053_v54, 0.0 }
 0x190   : > { %1054 = vpow2.f32 %v510_v55  ;;  %525 = vadd.xlane.f32.xlu0 %v524_v56 }
 0x191   : > { %1056 = vpow2.f32 %v482_v57 }
 0x192   : > { %1058 = vpow2.f32 %v480_v61 }
 0x193   : > { %1060 = vpow2.f32 %v476_v62 }
 0x194   : > { %1062 = vpow2.f32 %v478_v0 }
 0x196   : > { %v1055_v58 = vpop.eup %1054 }
 0x197   : > { %972 = vmatmul.msk.f32.vlgmr.msrb.gmra.mxu1 %vm330_vm0, %v1055_v58  ;;  %v527_v59 = vsel %vm330_vm0, %v1055_v58, 0.0  ;;  %v1057_v60 = vpop.eup %1056 }
 0x198   : > { %528 = vadd.xlane.f32.xlu2 %v527_v59  ;;  %v1059_v63 = vpop.eup %1058  ;;  %v523_v8 = vmul.f32 %v1057_v60, %v519_v7 }
 0x199   : > { %v1061_v1 = vpop.eup %1060  ;;  %v522_v4 = vmul.f32 %v1059_v63, %v518_v3 }
 0x19a   : > { %v1063_v2 = vpop.eup %1062  ;;  %v520_v14 = vmul.f32 %v1061_v1, %v516_v12 }
 0x19b   : > { %v521_v20 = vmul.f32 %v1063_v2, %v517_v18 }
 0x19f   : > { %566 = vperm.xlu1 %1046, %v1057_v60  }
 0x1b0   : > { %561 = vperm.xlu2 %1044, %v1059_v63  }
 0x1b8   : > { %551 = vperm.xlu2 %1044, %v1061_v1  }
 0x1c0   : > { %556 = vperm.xlu2 %1044, %v1063_v2  }
 0x1f1   : > { %v532_v5 = vpop.xlane.xlu2 %531 }
 0x1f2   : > { %v538_v6 = vadd.f32 %v532_v5, %v522_v4  ;;  %v1047_v4 = vld [vmem:[%s1388_s4] ss:$0 sm:$0xff] }
 0x1f4   : > { %543 = vst.msk [vmem:[#allocation3 + $0x10] sm:$0xff] %vm321_vm1, %v538_v6 }
 0x1f9   : > { %v535_v9 = vpop.xlane.xlu1 %534 }
 0x1fa   : > { %v539_v10 = vadd.f32 %v535_v9, %v523_v8 }
 0x1fb   : > { %v686_v11 = vld [vmem:[#allocation3 + $0x10] sm:$0xff] }
 0x1fc   : > { %544 = vst.msk [vmem:[#allocation3 + $0x18] sm:$0xff] %vm321_vm1, %v539_v10  ;;  %1064 = vrcp.f32 %v686_v11 }
 0x200   : > { %v639_v33 = vpop.f32.mrf.mxu2 }
 0x202   : > { %v1065_v13 = vpop.eup %1064 }
 0x203   : > { %704 = vperm.xlu0 %1045, %v1065_v13   ;;  %v526_v15 = vpop.xlane.xlu0 %525  ;;  %v687_v16 = vld [vmem:[#allocation3 + $0x18] sm:$0xff] }
 0x204   : > { %v536_v17 = vadd.f32 %v526_v15, %v520_v14  ;;  %1066 = vrcp.f32 %v687_v16 }
 0x206   : > { %541 = vst.msk [vmem:[#allocation3] sm:$0xff] %vm321_vm1, %v536_v17 }
 0x208   : > { %v662_v28 = vpop.f32.mrf.mxu3 }
 0x20a   : > { %v1067_v19 = vpop.eup %1066 }
 0x20b   : > { %v529_v21 = vpop.xlane.xlu2 %528  ;;  %709 = vperm.xlu2 %1044, %v1067_v19  }
 0x20c   : > { %v537_v22 = vadd.f32 %v529_v21, %v521_v20  ;;  %v593_v40 = vpop.f32.mrf.mxu0 }
 0x20d   : > { %v684_v23 = vld [vmem:[#allocation3] sm:$0xff] }
 0x20e   : > { %542 = vst.msk [vmem:[#allocation3 + $0x8] sm:$0xff] %vm321_vm1, %v537_v22  ;;  %1068 = vrcp.f32 %v684_v23 }
 0x211   : > { %v567_v25 = vpop.permute.xlu1 %566 }
 0x212   : > { %v572_v27 = vmul.f32 %v567_v25, %v548_v24 }
 0x213   : > { %v562_v29 = vpop.permute.xlu2 %561 }
 0x214   : > { %v1069_v30 = vpop.eup %1068  ;;  %v668_v31 = vadd.f32 %v662_v28, %v572_v27  ;;  %v571_v32 = vmul.f32 %v562_v29, %v547_v26  ;;  %v616_v45 = vpop.f32.mrf.mxu1 }
 0x215   : > { %694 = vperm.xlu1 %1046, %v1069_v30   ;;  %v685_v34 = vld [vmem:[#allocation3 + $0x8] sm:$0xff] }
 0x216   : > { %672 = vst.msk [vmem:[#allocation4 + $0x18] sm:$0xff] %vm330_vm0, %v668_v31  ;;  %v667_v35 = vadd.f32 %v639_v33, %v571_v32  ;;  %1070 = vrcp.f32 %v685_v34 }
 0x218   : > { %671 = vst.msk [vmem:[#allocation4 + $0x10] sm:$0xff] %vm330_vm0, %v667_v35 }
 0x21b   : > { %v552_v37 = vpop.permute.xlu2 %551 }
 0x21c   : > { %v1071_v38 = vpop.eup %1070  ;;  %v569_v39 = vmul.f32 %v552_v37, %v545_v36 }
 0x21d   : > { %699 = vperm.xlu2 %1044, %v1071_v38   ;;  %v683_v51 = vld [vmem:[#allocation4 + $0x18] sm:$0xff] }
 0x21e   : > { %v665_v41 = vadd.f32 %v593_v40, %v569_v39 }
 0x21f   : > { %v682_v55 = vld [vmem:[#allocation4 + $0x10] sm:$0xff] }
 0x220   : > { %669 = vst.msk [vmem:[#allocation4] sm:$0xff] %vm330_vm0, %v665_v41 }
 0x223   : > { %v557_v43 = vpop.permute.xlu2 %556 }
 0x224   : > { %v570_v44 = vmul.f32 %v557_v43, %v546_v42 }
 0x226   : > { %v666_v46 = vadd.f32 %v616_v45, %v570_v44 }
 0x227   : > { %v680_v60 = vld [vmem:[#allocation4] sm:$0xff] }
 0x228   : > { %670 = vst.msk [vmem:[#allocation4 + $0x8] sm:$0xff] %vm330_vm0, %v666_v46 }
 0x22f   : > { %v681_v57 = vld [vmem:[#allocation4 + $0x8] sm:$0xff] }
 0x265   : > { %v710_v52 = vpop.permute.xlu2 %709 }
 0x266   : > { %v715_v53 = vmul.f32 %v710_v52, %v683_v51 }
 0x268   : > { %978 = vmatmul.msk.f32.vlgmr.msra.gmra.mxu3 %vm330_vm0, %v715_v53 }
 0x275   : > { %v705_v54 = vpop.permute.xlu0 %704 }
 0x276   : > { %v714_v56 = vmul.f32 %v705_v54, %v682_v55 }
 0x277   : > { %v700_v58 = vpop.permute.xlu2 %699 }
 0x278   : > { %v713_v59 = vmul.f32 %v700_v58, %v681_v57  ;;  %977 = vmatmul.msk.f32.vlgmr.msra.gmra.mxu2 %vm330_vm0, %v714_v56 }
 0x27a   : > { %976 = vmatmul.msk.f32.vlgmr.msra.gmra.mxu1 %vm330_vm0, %v713_v59 }
 0x287   : > { %v695_v61 = vpop.permute.xlu1 %694 }
 0x288   : > { %v712_v62 = vmul.f32 %v695_v61, %v680_v60 }
 0x28a   : > { %975 = vmatmul.msk.f32.vlgmr.msra.gmra.mxu0 %vm330_vm0, %v712_v62 }
 0x2eb   : > { %v809_v5 = vpop.f32.mrf.mxu3 }
 0x2f7   : > { %v763_v63 = vpop.f32.mrf.mxu1 }
 0x2fb   : > { %v786_v2 = vpop.f32.mrf.mxu2 }
 0x307   : > { %v740_v0 = vpop.f32.mrf.mxu0 }
 0x308   : > { %v812_v1 = vadd.f32 %v763_v63, %v740_v0 }
 0x30a   : > { %v813_v3 = vadd.f32 %v812_v1, %v786_v2 }
 0x30c   : > { %v814_v6 = vadd.f32 %v813_v3, %v809_v5 }
 0x30e   : > { %v819_v7 = vadd.f32 %v1047_v4, %v814_v6 }
 0x310   : > { %820 = vst [vmem:[%s292_s25] sm:$0xff] %v819_v7 }
 0x311   : > { %1099 = shalt.err (!%p1096_p5)
}
 0x312   : > { %986 = dma.vmem_to_hbm [thread:$0]  (%p1225_p4), %s836_s27, 128, %s838_s29, %s822_s21  }
 0x313 PF: > { %p992_p6 = scmp.ge.s32.totalorder %s1150_s23, 2  ;;  %s849_s11 = sand.u32 1, %s1130_s18  }
 0x314   : > { %s850_s15 = scalar_lea.sflag [#allocation6], %s849_s11 }
 0x315   : > { %p989_p7 = pnand %p992_p6, %p1232_p8 }
 0x317   : > { %p990_p9 = pneg %p989_p7 }
 0x319   : > { %1125 = dma.done.wait (%p990_p9), %s850_s15, 128  }
 0x31a   : > { %1127 = vsyncadd (%p990_p9), %s850_s15, 4294967168  ;;  %s18_s23 = sadd.s32 1, %s1150_s23   ;;  %s1392_s18 = smov %s1134_s19 }
 0x31b   : > { %p15_p10 = scmp.ge.s32.totalorder %s18_s23, 4   ;;  %s1393_s19 = smov %s1138_s20 }
 0x31c   : > { %s1394_s20 = smov %s1238_s6  ;;  %s1395_s21 = smov %s1146_s22 }
 0x31d   : > { %s1396_s22 = smov %s1398_s26  ;;  %17 = sbr.rel (!%p15_p10) target bundleno = 4 (0x4), region = 89 }
 0x322   :  { %856 = vsyncpa [#allocation6], 1 }
 0x323   :  { %858 = vsyncpa [#allocation6 + $0x1], 1 }

</bundles_post_ra>
